<compile_context>
chip_gen: v6e
topology: v6e:2x2x1
jax: 0.10.0
libtpu: 0.0.40
codegen_flags: <defaults>
</compile_context>

<pallas_src>
import jax
import jax.numpy as jnp
from jax.experimental import pallas as pl
from jax.experimental.pallas import tpu as pltpu


def _round_up(x, m):
    return (x + m - 1) // m * m


def _largest_divisor_tile(padded, unit, max_units):
    """Largest multiple of `unit` that divides `padded`, capped at max_units*unit."""
    nb = padded // unit
    for d in range(min(max_units, nb), 0, -1):
        if nb % d == 0:
            return d * unit
    return unit


# --------------------------------------------------------------------------
# Kernels
# --------------------------------------------------------------------------
def lr_kernel_single(x_ref, w_ref, b_ref, o_ref):
    # x: (tm, Dp)  w: (Dp, tn)  b: (1, tn) f32  o: (tm, tn)
    acc = jnp.dot(x_ref[...], w_ref[...], preferred_element_type=jnp.float32)
    o_ref[...] = jax.nn.sigmoid(acc + b_ref[...]).astype(o_ref.dtype)


def lr_kernel_multi(x_ref, w_ref, b_ref, o_ref, acc_ref):
    # x: (tm, tk)  w: (tk, tn)  b: (1, tn) f32  o: (tm, tn)  acc: (tm, tn) f32
    k = pl.program_id(2)
    prod = jnp.dot(x_ref[...], w_ref[...], preferred_element_type=jnp.float32)

    @pl.when(k == 0)
    def _():
        acc_ref[...] = prod          # first step writes directly (no zero-init RMW)

    @pl.when(k != 0)
    def _():
        acc_ref[...] += prod

    @pl.when(k == pl.num_programs(2) - 1)
    def _():
        o_ref[...] = jax.nn.sigmoid(acc_ref[...] + b_ref[...]).astype(o_ref.dtype)


# --------------------------------------------------------------------------
# Wrappers
# --------------------------------------------------------------------------
def prepare_lr_params(weight, bias, *, compute_dtype=jnp.bfloat16):
    """One-time: transpose weight to (D, O), pad to 128-aligned, cast.

    weight: PyTorch layout (O, D).  Returns (w_padded (Dp, Op), bias_padded (1, Op) f32).
    """
    O, D = weight.shape
    Dp = _round_up(D, 128)
    Op = _round_up(O, 128)
    w_t = weight.T.astype(compute_dtype)                       # (D, O)
    if (Dp, Op) != (D, O):
        w_t = jnp.pad(w_t, ((0, Dp - D), (0, Op - O)))
    b = bias.astype(jnp.float32)
    if Op != O:
        b = jnp.pad(b, (0, Op - O))
    return w_t, b.reshape(1, Op)


def lr_forward_prepared(x, w_p, b_p, output_dim, *,
                        compute_dtype=None, tm=None, tn=None, tk=None):
    """sigmoid(x @ W^T + b) using pre-transposed / pre-padded params."""
    if compute_dtype is None:
        compute_dtype = w_p.dtype
    B, D = x.shape
    Dp, Op = w_p.shape
    out_dtype = x.dtype
    in_isz = jnp.dtype(compute_dtype).itemsize
    out_isz = jnp.dtype(out_dtype).itemsize

    # ---- tile selection ---------------------------------------------------
    Bp0 = _round_up(B, 8)
    if tm is None:
        tm = _largest_divisor_tile(Bp0, 8, 64)                 # <= 512, mult of 8
    Bp = _round_up(B, tm)
    grid_i = Bp // tm

    if tn is None:
        tn = _largest_divisor_tile(Op, 128, 4)                 # <= 512, mult of 128
        # v7x megacore: ensure a parallel axis has >= 2 blocks when B is small.
        if grid_i == 1 and Op // tn == 1 and Op // 128 >= 2:
            tn = _largest_divisor_tile(Op, 128, Op // 256)
    assert Op % tn == 0, "tn must divide the padded output dim"
    grid_j = Op // tn

    if tk is None:
        k_cap = 4096 if in_isz <= 2 else 2048
        tk = _largest_divisor_tile(Dp, 128, k_cap // 128)
    assert Dp % tk == 0, "tk must divide the padded feature dim"
    grid_k = Dp // tk
    single_k = grid_k == 1

    # ---- per-call x pad + cast (weight/bias already prepared) -------------
    xp = x.astype(compute_dtype)
    if (Bp, Dp) != (B, D):
        xp = jnp.pad(xp, ((0, Bp - B), (0, Dp - D)))

    # ---- VMEM limit: double-buffered tiles + f32 acc, generation-aware ----
    live_bytes = (2 * ((tm * tk + tk * tn) * in_isz + tn * 4 + tm * tn * out_isz)
                  + tm * tn * 4)
    try:
        vmem_cap = int(pltpu.get_tpu_info().vmem_capacity_bytes)
    except Exception:
        vmem_cap = 64 << 20                                    # conservative (v7x)
    vmem_limit = int(min(max(2 * live_bytes, 32 << 20), (vmem_cap * 3) // 4))

    cost = pl.CostEstimate(
        flops=2 * Bp * Dp * Op,
        transcendentals=Bp * Op,
        bytes_accessed=(Bp * Dp * in_isz * grid_j              # x re-read per j tile
                        + Dp * Op * in_isz * grid_i            # W re-read per i tile
                        + Op * 4 * grid_i
                        + Bp * Op * out_isz),
    )

    if single_k:
        grid_spec = pltpu.PrefetchScalarGridSpec(
            num_scalar_prefetch=0,
            grid=(grid_i, grid_j),
            in_specs=[
                pl.BlockSpec((tm, tk), lambda i, j: (i, 0)),   # x
                pl.BlockSpec((tk, tn), lambda i, j: (0, j)),   # W (D, O)
                pl.BlockSpec((1, tn), lambda i, j: (0, j)),    # bias
            ],
            out_specs=pl.BlockSpec((tm, tn), lambda i, j: (i, j)),
        )
        kernel = lr_kernel_single
        dims = ("parallel", "parallel")
    else:
        grid_spec = pltpu.PrefetchScalarGridSpec(
            num_scalar_prefetch=0,
            grid=(grid_i, grid_j, grid_k),
            in_specs=[
                pl.BlockSpec((tm, tk), lambda i, j, k: (i, k)),  # x
                pl.BlockSpec((tk, tn), lambda i, j, k: (k, j)),  # W (D, O)
                pl.BlockSpec((1, tn), lambda i, j, k: (0, j)),   # bias
            ],
            out_specs=pl.BlockSpec((tm, tn), lambda i, j, k: (i, j)),
            scratch_shapes=[pltpu.VMEM((tm, tn), jnp.float32)],
        )
        kernel = lr_kernel_multi
        dims = ("parallel", "parallel", "arbitrary")

    out_p = pl.pallas_call(
        kernel,
        out_shape=jax.ShapeDtypeStruct((Bp, Op), out_dtype),
        grid_spec=grid_spec,
        compiler_params=pltpu.CompilerParams(
            dimension_semantics=dims,
            vmem_limit_bytes=vmem_limit,
        ),
        cost_estimate=cost,
    )(xp, w_p, b_p)

    return out_p[:B, :output_dim]


def lr_forward(x, weight, bias, *, compute_dtype=jnp.bfloat16,
               tm=None, tn=None, tk=None):
    """sigmoid(x @ weight.T + bias); weight in PyTorch (O, D) layout."""
    O = weight.shape[0]
    w_p, b_p = prepare_lr_params(weight, bias, compute_dtype=compute_dtype)
    return lr_forward_prepared(x, w_p, b_p, O,
                               compute_dtype=compute_dtype, tm=tm, tn=tn, tk=tk)


def init_params(key, input_dim, output_dim):
    """Deterministic init matching nn.Linear + kaiming_uniform_(sigmoid)."""
    kw, kb = jax.random.split(key)
    bound_w = jnp.sqrt(3.0 / input_dim)                        # gain(sigmoid) = 1
    weight = jax.random.uniform(
        kw, (output_dim, input_dim), jnp.float32, -bound_w, bound_w)
    bound_b = 1.0 / jnp.sqrt(jnp.float32(input_dim))
    bias = jax.random.uniform(
        kb, (output_dim,), jnp.float32, -bound_b, bound_b)
    return weight, bias


if __name__ == "__main__":
    key = jax.random.PRNGKey(0)
    k_x, k_p, k_x2, k_p2 = jax.random.split(key, 4)

    # --- Small demo shapes consistent with the module -----------------------
    batch, input_dim, output_dim = 8, 32, 16
    x = jax.random.normal(k_x, (batch, input_dim), jnp.float32)
    weight, bias = init_params(k_p, input_dim, output_dim)
    ref = jax.nn.sigmoid(x @ weight.T + bias)

    # f32 compute path: exact check of the kernel math / padding / epilogue.
    out_f32 = jax.block_until_ready(
        lr_forward(x, weight, bias, compute_dtype=jnp.float32))
    assert out_f32.shape == (batch, output_dim)
    assert jnp.allclose(out_f32, ref, atol=1e-5), "f32 path mismatch"

    # bf16 fast path (default): MXU-native operands, f32 accumulate + sigmoid.
    out_bf16 = jax.block_until_ready(lr_forward(x, weight, bias))
    assert jnp.allclose(out_bf16, ref, atol=2e-2), "bf16 path mismatch"

    # --- Larger check: prepared params (one-time pad/transpose/cast), plus a
    # forced small tk to exercise the multi-step K-reduction accumulator path.
    B2, D2, O2 = 256, 640, 200
    x2 = jax.random.normal(k_x2, (B2, D2), jnp.float32)
    w2, b2 = init_params(k_p2, D2, O2)
    ref2 = jax.nn.sigmoid(x2 @ w2.T + b2)

    w2_p, b2_p = prepare_lr_params(w2, b2, compute_dtype=jnp.bfloat16)
    out2 = jax.block_until_ready(lr_forward_prepared(x2, w2_p, b2_p, O2))
    assert out2.shape == (B2, O2)
    assert jnp.allclose(out2, ref2, atol=3e-2, rtol=3e-2), "tiled bf16 mismatch"

    out3 = jax.block_until_ready(
        lr_forward(x2, w2, b2, compute_dtype=jnp.float32, tk=128))
    assert jnp.allclose(out3, ref2, atol=2e-3, rtol=2e-3), "multi-K f32 mismatch"

    print("KERNEL_OK")
</pallas_src>

<mosaic_0001>
module attributes {stable_mosaic.version = 11 : i64} {
  func.func @lr_kernel_single(%arg0: i32, %arg1: i32, %arg2: memref<8x128xf32, #tpu.memory_space<vmem>>, %arg3: memref<128x128xf32, #tpu.memory_space<vmem>>, %arg4: memref<1x128xf32, #tpu.memory_space<vmem>>, %arg5: memref<8x128xf32, #tpu.memory_space<vmem>>) attributes {dimension_semantics = [#tpu.dimension_semantics<parallel>, #tpu.dimension_semantics<parallel>], iteration_bounds = array<i64: 1, 1>, scalar_prefetch = 0 : i64, scratch_operands = 0 : i64, tpu.core_type = #tpu.core_type<tc>, window_params = [{transform_indices = @transform_0, window_bounds = array<i64: 8, 128>}, {transform_indices = @transform_1, window_bounds = array<i64: 128, 128>}, {transform_indices = @transform_2, window_bounds = array<i64: 1, 128>}, {transform_indices = @transform_3, window_bounds = array<i64: 8, 128>}]} {
    %c0 = arith.constant 0 : index
    %c0_0 = arith.constant 0 : index
    %0 = vector.load %arg2[%c0, %c0_0] : memref<8x128xf32, #tpu.memory_space<vmem>>, vector<8x128xf32>
    %c0_1 = arith.constant 0 : index
    %c0_2 = arith.constant 0 : index
    %1 = vector.load %arg3[%c0_1, %c0_2] : memref<128x128xf32, #tpu.memory_space<vmem>>, vector<128x128xf32>
    %cst = arith.constant dense<0.000000e+00> : vector<8x128xf32>
    %2 = tpu.matmul %0, %1, %cst {dimension_numbers = #tpu.dot_dimension_numbers<[1], [0], [0], [1], [0, 0, 1, 1], [], []>} : vector<8x128xf32>, vector<128x128xf32>, vector<8x128xf32> -> vector<8x128xf32>
    %c0_3 = arith.constant 0 : index
    %c0_4 = arith.constant 0 : index
    %3 = vector.load %arg4[%c0_3, %c0_4] : memref<1x128xf32, #tpu.memory_space<vmem>>, vector<1x128xf32>
    %4 = vector.broadcast %3 : vector<1x128xf32> to vector<8x128xf32>
    %5 = arith.addf %2, %4 : vector<8x128xf32>
    %6 = arith.negf %5 : vector<8x128xf32>
    %7 = math.exp %6 : vector<8x128xf32>
    %cst_5 = arith.constant 1.000000e+00 : f32
    %8 = vector.broadcast %cst_5 : f32 to vector<8x128xf32>
    %9 = arith.addf %8, %7 : vector<8x128xf32>
    %10 = arith.divf %8, %9 : vector<8x128xf32>
    %c0_6 = arith.constant 0 : index
    %c0_7 = arith.constant 0 : index
    %11 = vector.load %arg5[%c0_6, %c0_7] : memref<8x128xf32, #tpu.memory_space<vmem>>, vector<8x128xf32>
    tpu.vector_store %arg5[%c0_6, %c0_7], %10 {strides = array<i32>} : memref<8x128xf32, #tpu.memory_space<vmem>>, vector<8x128xf32>,
    return
  }
  func.func @transform_0(%arg0: i32, %arg1: i32) -> (i32, i32) {
    %c0_i32 = arith.constant 0 : i32
    %c0_i32_0 = arith.constant 0 : i32
    return %arg0, %c0_i32 : i32, i32
  }
  func.func @transform_1(%arg0: i32, %arg1: i32) -> (i32, i32) {
    %c0_i32 = arith.constant 0 : i32
    %c0_i32_0 = arith.constant 0 : i32
    return %c0_i32, %arg1 : i32, i32
  }
  func.func @transform_2(%arg0: i32, %arg1: i32) -> (i32, i32) {
    %c0_i32 = arith.constant 0 : i32
    %c0_i32_0 = arith.constant 0 : i32
    return %c0_i32, %arg1 : i32, i32
  }
  func.func @transform_3(%arg0: i32, %arg1: i32) -> (i32, i32) {
    %c0_i32 = arith.constant 0 : i32
    return %arg0, %arg1 : i32, i32
  }
}

</mosaic_0001>

<bundles_post_ra>
// kernel: tpu_custom_call.1
= control target key start
LH: loop header
LB: loop body
LE: loop exit
PB: predicated region body
PF: predicated region fallthrough
CT: control target
= control target key end

     0   :  { %8 = vsyncpa [#allocation3], 0  ;;  %s328_s0 = inlined_call_operand.hbm [shape: f32[8,128], index: 0, kind: input, shape index: {}]   ;;  %s329_s1 = inlined_call_operand.hbm [shape: f32[128,128], index: 1, kind: input, shape index: {}]   ;;  %s330_s2 = inlined_call_operand.vmem [shape: f32[1,128], index: 2, kind: input, shape index: {}]   ;;  %s331_s3 = inlined_call_operand.hbm [shape: f32[8,128], index: 3, kind: output, shape index: {}]  }
   0x1   :  { %9 = vsyncpa [#allocation6], 0 }
   0x2   :  { %10 = vsyncpa [#allocation4], 0  ;;  %s289_s12 = smov [#allocation2]   ;;  %s290_s14 = smov [#allocation5]  }
   0x3   :  { %s17_s13 = sshll.u32 %s289_s12, 4  ;;  %s26_s15 = sshll.u32 %s290_s14, 4  ;;  %s18_s13 = int_to_ptr.vmem [resolvable:$true] %s17_s13  ;;  %s27_s15 = int_to_ptr.vmem [resolvable:$true] %s26_s15 }
   0x4   :  { %s231_s16 = scalar_lea.vmem %s18_s13, 128  ;;  %p236_p1 = scmp.lt.s32.totalorder %s18_s13, %s18_s13 }
   0x5   :  { %p232_p0 = scmp.ne.s32.totalorder %s18_s13, %s231_s16  ;;  %p237_p2 = scmp.lt.s32.totalorder %s231_s16, %s231_s16 }
   0x7   :  { %p238_p3 = por %p237_p2, %p236_p1 }
   0x9   :  { %p239_p4 = pnand %p238_p3, %p232_p0 }
   0xb   :  { %242 = shalt.err (!%p239_p4)
}
   0xc   :  { %20 = dma.hbm_to_vmem [thread:$0]  %s328_s0, 128, %s18_s13, [#allocation3]  }
   0xd   :  { %s251_s19 = scalar_lea.vmem %s27_s15, 2048  ;;  %p256_p6 = scmp.lt.s32.totalorder %s27_s15, %s27_s15 }
   0xe   :  { %p252_p5 = scmp.ne.s32.totalorder %s27_s15, %s251_s19  ;;  %p257_p7 = scmp.lt.s32.totalorder %s251_s19, %s251_s19 }
  0x10   :  { %p258_p8 = por %p257_p7, %p256_p6 }
  0x12   :  { %p259_p9 = pnand %p258_p8, %p252_p5 }
  0x14   :  { %262 = shalt.err (!%p259_p9)
}
  0x15   :  { %s291_s20 = smov 128   ;;  %s292_s21 = smov 8  }
  0x16   :  { %32 = dma.hbm_to_vmem [thread:$0]  %s329_s1, 2048, %s27_s15, [#allocation6], %s291_s20, %s291_s20, %s292_s21  }
  0x17   :  { %283 = dma.done.wait [#allocation3], 128  }
  0x18   :  { %284 = vsyncadd [#allocation3], 4294967168 }
  0x19   :  { %285 = dma.done.wait [#allocation6], 2048  }
  0x1a   :  { %286 = vsyncadd [#allocation6], 4294965248  ;;  %v293_v0 = vmov 0.0   ;;  %vm294_vm0 = vmmov 0   ;;  %v57_v1 = vld [vmem:[#allocation5 + $0x78] sm:$0xff]  ;;  %v56_v2 = vld [vmem:[#allocation5 + $0x70] sm:$0xff] }
  0x1b   :  { %177 = vmatprep.subr.mxu0 %v293_v0  ;;  %209 = vmatprep.mubr.msk.f32.mxu0 %vm294_vm0, %v293_v0  ;;  %v55_v3 = vld [vmem:[#allocation5 + $0x68] sm:$0xff]  ;;  %v54_v4 = vld [vmem:[#allocation5 + $0x60] sm:$0xff]  ;;  %v53_v5 = vld [vmem:[#allocation5 + $0x58] sm:$0xff]  ;;  %s295_s24 = smov [#allocation7]  }
  0x1c   :  { %178 = vmatpush3.msra.mxu0 %v57_v1  ;;  %v52_v6 = vld [vmem:[#allocation5 + $0x50] sm:$0xff]  ;;  %v51_v7 = vld [vmem:[#allocation5 + $0x48] sm:$0xff]  ;;  %v50_v8 = vld [vmem:[#allocation5 + $0x40] sm:$0xff]  ;;  %s148_s25 = sshll.u32 %s295_s24, 4  ;;  %s149_s25 = int_to_ptr.vmem [resolvable:$true] %s148_s25 }
  0x1d   :  { %179 = vmatprep.subr.mxu0 %v293_v0  ;;  %v49_v9 = vld [vmem:[#allocation5 + $0x38] sm:$0xff]  ;;  %v48_v10 = vld [vmem:[#allocation5 + $0x30] sm:$0xff]  ;;  %v47_v11 = vld [vmem:[#allocation5 + $0x28] sm:$0xff]  ;;  %s263_s26 = scalar_lea.vmem %s149_s25, 128  ;;  %p268_p11 = scmp.lt.s32.totalorder %s149_s25, %s149_s25 }
  0x1e   :  { %180 = vmatpush3.msra.mxu0 %v56_v2  ;;  %v46_v12 = vld [vmem:[#allocation5 + $0x20] sm:$0xff]  ;;  %v45_v13 = vld [vmem:[#allocation5 + $0x18] sm:$0xff]  ;;  %v44_v14 = vld [vmem:[#allocation5 + $0x10] sm:$0xff]  ;;  %p264_p10 = scmp.ne.s32.totalorder %s149_s25, %s263_s26  ;;  %p269_p12 = scmp.lt.s32.totalorder %s263_s26, %s263_s26 }
  0x1f   :  { %181 = vmatprep.subr.mxu0 %v293_v0  ;;  %v43_v15 = vld [vmem:[#allocation5 + $0x8] sm:$0xff]  ;;  %v42_v16 = vld [vmem:[#allocation5] sm:$0xff]  ;;  %v41_v17 = vld [vmem:[#allocation2] sm:$0xff] }
  0x20   :  { %182 = vmatpush3.msra.mxu0 %v55_v3  ;;  %v158_v18 = vld [vmem:[%s330_s2] ss:$0 sm:$0xff]  ;;  %p270_p13 = por %p269_p12, %p268_p11 }
  0x21   :  { %183 = vmatprep.subr.mxu0 %v293_v0 }
  0x22   :  { %184 = vmatpush3.msra.mxu0 %v54_v4  ;;  %p271_p0 = pnand %p270_p13, %p264_p10 }
  0x23   :  { %185 = vmatprep.subr.mxu0 %v293_v0 }
  0x24   :  { %186 = vmatpush3.msra.mxu0 %v53_v5 }
  0x25   :  { %187 = vmatprep.subr.mxu0 %v293_v0 }
  0x26   :  { %188 = vmatpush3.msra.mxu0 %v52_v6 }
  0x27   :  { %189 = vmatprep.subr.mxu0 %v293_v0 }
  0x28   :  { %190 = vmatpush3.msra.mxu0 %v51_v7 }
  0x29   :  { %191 = vmatprep.subr.mxu0 %v293_v0 }
  0x2a   :  { %192 = vmatpush3.msra.mxu0 %v50_v8 }
  0x2b   :  { %193 = vmatprep.subr.mxu0 %v293_v0 }
  0x2c   :  { %194 = vmatpush3.msra.mxu0 %v49_v9 }
  0x2d   :  { %195 = vmatprep.subr.mxu0 %v293_v0 }
  0x2e   :  { %196 = vmatpush3.msra.mxu0 %v48_v10 }
  0x2f   :  { %197 = vmatprep.subr.mxu0 %v293_v0 }
  0x30   :  { %198 = vmatpush3.msra.mxu0 %v47_v11 }
  0x31   :  { %199 = vmatprep.subr.mxu0 %v293_v0 }
  0x32   :  { %200 = vmatpush3.msra.mxu0 %v46_v12 }
  0x33   :  { %201 = vmatprep.subr.mxu0 %v293_v0 }
  0x34   :  { %202 = vmatpush3.msra.mxu0 %v45_v13 }
  0x35   :  { %203 = vmatprep.subr.mxu0 %v293_v0 }
  0x36   :  { %204 = vmatpush3.msra.mxu0 %v44_v14 }
  0x37   :  { %205 = vmatprep.subr.mxu0 %v293_v0 }
  0x38   :  { %206 = vmatpush3.msra.mxu0 %v43_v15 }
  0x39   :  { %207 = vmatprep.subr.mxu0 %v293_v0 }
  0x3a   :  { %208 = vmatpush3.msra.mxu0 %v42_v16 }
  0x3b   :  { %210 = vmatmul.mubr.f32.vlgmr.msra.gmra.mxu0 %v41_v17 }
  0xfb   :  { %v131_v19 = vpop.f32.mrf.mxu0 }
  0xfc   :  { %v132_v20 = vadd.f32 %v158_v18, %v131_v19 }
  0xfd   :  { %v211_v21 = vpop.f32.mrf.mxu0 }
  0xfe   :  { %v159_v22 = vmul.f32 -1.442695, %v132_v20 }
 0x100   :  { %219 = vpow2.f32 %v159_v22 }
 0x10d   :  { %v220_v23 = vpop.eup %219 }
 0x10e   :  { %v138_v24 = vadd.f32 1.0, %v220_v23 }
 0x110   :  { %221 = vrcp.f32 %v138_v24 }
 0x11d   :  { %v222_v25 = vpop.eup %221 }
 0x11e   :  { %141 = vst [vmem:[#allocation7] sm:$0xff] %v222_v25 }
 0x11f   :  { %274 = shalt.err (!%p271_p0)
}
 0x120   :  { %151 = dma.vmem_to_hbm [thread:$0]  %s149_s25, 128, %s331_s3, [#allocation4]  }
 0x121   :  { %287 = dma.done.wait [#allocation4], 128  }
 0x122   :  { %288 = vsyncadd [#allocation4], 4294967168 }
 0x123   :  { %155 = vsyncpa [#allocation3], 1 }
 0x124   :  { %156 = vsyncpa [#allocation6], 1 }
 0x125   :  { %157 = vsyncpa [#allocation4], 1 }

</bundles_post_ra>
